<compile_context>
chip_gen: v5e
topology: v5e:2x2
jax: 0.10.0
libtpu: 0.0.40
codegen_flags: <defaults>
</compile_context>

<pallas_src>
import math

import jax
import jax.numpy as jnp
from jax.experimental import pallas as pl
from jax.experimental.pallas import tpu as pltpu


def _round_up(x: int, m: int) -> int:
    return ((x + m - 1) // m) * m


def _vmem_limit_bytes() -> int:
    """Generation-aware scoped-VMEM budget (~80% of physical: ~102 MiB v5e/v6e, ~51 MiB v7x)."""
    cap = 64 * 1024 * 1024
    try:
        info = pltpu.get_tpu_info()
        cap = int(getattr(info, "vmem_capacity_bytes", cap) or cap)
    except Exception:
        pass
    return int(cap * 0.8)


def _working_set_bytes(tm: int, tf: int, k: int, in_bytes: int, out_bytes: int) -> int:
    x_blk = tm * k * in_bytes            # x tile
    w_up_blk = k * tf * in_bytes         # W1^T / W3^T tiles (each)
    w_dn_blk = tf * k * in_bytes         # W2^T tile
    o_blk = tm * k * out_bytes           # output tile
    acc = tm * k * 4                     # f32 accumulator scratch
    # conservative: every BlockSpec operand double-buffered by the pipeline
    return 2 * (x_blk + 2 * w_up_blk + w_dn_blk + o_blk) + acc


def _select_tiles(m_pad: int, f_pad: int, k: int, in_bytes: int, out_bytes: int, budget: int):
    """Largest MXU-friendly tiles whose pipelined working set fits the VMEM budget."""
    if m_pad >= 256:
        tm_cands = [t for t in (256, 128, 64, 32, 16, 8) if m_pad % t == 0]
    else:
        tm_cands = [m_pad]
    tf_cands = [t for t in (512, 256, 128) if f_pad % t == 0] or [f_pad]
    for tm in tm_cands:
        for tf in tf_cands:
            if _working_set_bytes(tm, tf, k, in_bytes, out_bytes) <= budget:
                return tm, tf
    # TODO(synk): fall back to a K-tiled two-kernel variant for pathological d_model sizes.
    raise ValueError(
        f"SwiGLU tile selection could not fit the VMEM budget of {budget} bytes "
        f"(M={m_pad}, F={f_pad}, K={k})."
    )


def _swiglu_fused_kernel(x_ref, w1_ref, w3_ref, w2_ref, o_ref, acc_ref):
    j = pl.program_id(1)

    x = x_ref[...]                                                        # [tm, K]  bf16
    g = jnp.dot(x, w1_ref[...], preferred_element_type=jnp.float32)      # [tm, tf] f32 (MXU)
    u = jnp.dot(x, w3_ref[...], preferred_element_type=jnp.float32)      # [tm, tf] f32 (MXU)
    h = (g * jax.nn.sigmoid(g) * u).astype(w2_ref.dtype)                 # silu(g)*u -> bf16
    part = jnp.dot(h, w2_ref[...], preferred_element_type=jnp.float32)   # [tm, K]  f32 (MXU)

    @pl.when(j == 0)
    def _():
        acc_ref[...] = part              # direct write: saves zero-init store + readback

    @pl.when(j > 0)
    def _():
        acc_ref[...] += part

    @pl.when(j == pl.num_programs(1) - 1)
    def _():
        o_ref[...] = acc_ref[...].astype(o_ref.dtype)


def swiglu_pallas(x: jax.Array, w1: jax.Array, w2: jax.Array, w3: jax.Array,
                  *, compute_dtype=jnp.bfloat16) -> jax.Array:
    """SwiGLU forward matching the PyTorch module: W2( silu(W1 x) * (W3 x) )."""
    *lead, d_model = x.shape
    d_filter = w1.shape[0]
    assert w1.shape == (d_filter, d_model), f"W1 shape {w1.shape}"
    assert w3.shape == (d_filter, d_model), f"W3 shape {w3.shape}"
    assert w2.shape == (d_model, d_filter), f"W2 shape {w2.shape}"

    out_dtype = x.dtype
    m = int(math.prod(lead)) if lead else 1
    x2d = x.reshape(m, d_model)

    # Pad M (full-MXU tiles; multiple of 256 for large M, of 8 otherwise) and d_filter
    # (multiple of 128).  Zero padding is exact: padded rows/cols contribute nothing.
    m_pad = _round_up(m, 256) if m >= 256 else _round_up(m, 8)
    f_pad = _round_up(d_filter, 128)

    in_bytes = jnp.dtype(compute_dtype).itemsize
    out_bytes = jnp.dtype(out_dtype).itemsize
    vmem_limit = _vmem_limit_bytes()
    tm, tf = _select_tiles(m_pad, f_pad, d_model, in_bytes, out_bytes,
                           budget=int(vmem_limit * 0.9))

    # One-time layout/dtype prep (amortized across the whole grid):
    #   x  -> [Mp, K] bf16 ; W1,W3 -> [K, Fp] bf16 ; W2 -> [Fp, K] bf16
    xp = jnp.pad(x2d, ((0, m_pad - m), (0, 0))).astype(compute_dtype)
    w1t = jnp.pad(w1.T, ((0, 0), (0, f_pad - d_filter))).astype(compute_dtype)
    w3t = jnp.pad(w3.T, ((0, 0), (0, f_pad - d_filter))).astype(compute_dtype)
    w2t = jnp.pad(w2.T, ((0, f_pad - d_filter), (0, 0))).astype(compute_dtype)

    grid = (m_pad // tm, f_pad // tf)

    out2d = pl.pallas_call(
        _swiglu_fused_kernel,
        out_shape=jax.ShapeDtypeStruct((m_pad, d_model), out_dtype),
        grid_spec=pltpu.PrefetchScalarGridSpec(
            num_scalar_prefetch=0,
            grid=grid,
            in_specs=[
                pl.BlockSpec((tm, d_model), lambda i, j: (i, 0)),   # x tile (resident over j)
                pl.BlockSpec((d_model, tf), lambda i, j: (0, j)),   # W1^T tile  [K, Fp]
                pl.BlockSpec((d_model, tf), lambda i, j: (0, j)),   # W3^T tile  [K, Fp]
                pl.BlockSpec((tf, d_model), lambda i, j: (j, 0)),   # W2^T tile  [Fp, K]
            ],
            out_specs=pl.BlockSpec((tm, d_model), lambda i, j: (i, 0)),
            scratch_shapes=[pltpu.VMEM((tm, d_model), jnp.float32)],
        ),
        compiler_params=pltpu.CompilerParams(
            dimension_semantics=("parallel", "arbitrary"),
            vmem_limit_bytes=vmem_limit,
        ),
    )(xp, w1t, w3t, w2t)

    return out2d[:m].reshape(*lead, d_model)


def init_linear_weight(key, in_features: int, out_features: int, dtype=jnp.float32):
    """Matches torch.nn.init.trunc_normal_(std=std, a=-3*std, b=3*std)."""
    std = 2.0 / math.sqrt(in_features + out_features)
    w = jax.random.truncated_normal(
        key, lower=-3.0, upper=3.0, shape=(out_features, in_features), dtype=jnp.float32
    ) * std
    return w.astype(dtype)


if __name__ == "__main__":
    # Small but TPU-aligned shapes: lane dims (d_model, d_filter) are multiples of 128,
    # M = batch*seq is a multiple of 8.
    batch, seq = 2, 8
    d_model = 128
    d_filter = 256

    key = jax.random.PRNGKey(0)
    kx, k1, k2, k3 = jax.random.split(key, 4)

    x = jax.random.normal(kx, (batch, seq, d_model), dtype=jnp.float32)
    w1 = init_linear_weight(k1, d_model, d_filter)   # [d_filter, d_model]
    w3 = init_linear_weight(k3, d_model, d_filter)   # [d_filter, d_model]
    w2 = init_linear_weight(k2, d_filter, d_model)   # [d_model, d_filter]

    y = swiglu_pallas(x, w1, w2, w3)
    jax.block_until_ready(y)

    # Pure-JAX reference of the PyTorch forward, with the same bf16 operand/intermediate
    # rounding as the kernel (f32 accumulation), so the check isolates kernel correctness.
    f32 = jnp.float32
    xb = x.astype(jnp.bfloat16).astype(f32)
    w1b = w1.astype(jnp.bfloat16).astype(f32)
    w3b = w3.astype(jnp.bfloat16).astype(f32)
    w2b = w2.astype(jnp.bfloat16).astype(f32)
    g_ref = jnp.einsum("bsk,fk->bsf", xb, w1b, precision=jax.lax.Precision.HIGHEST)
    u_ref = jnp.einsum("bsk,fk->bsf", xb, w3b, precision=jax.lax.Precision.HIGHEST)
    h_ref = (g_ref * jax.nn.sigmoid(g_ref) * u_ref).astype(jnp.bfloat16).astype(f32)
    y_ref = jnp.einsum("bsf,df->bsd", h_ref, w2b, precision=jax.lax.Precision.HIGHEST)

    assert y.shape == (batch, seq, d_model)
    max_err = float(jnp.max(jnp.abs(y - y_ref)))
    assert jnp.allclose(y, y_ref, atol=1e-2, rtol=1e-2), max_err

    print("KERNEL_OK")
</pallas_src>

<mosaic_0001>
module attributes {stable_mosaic.version = 11 : i64} {
  func.func @_swiglu_fused_kernel(%arg0: i32, %arg1: i32, %arg2: memref<16x128xbf16, #tpu.memory_space<vmem>>, %arg3: memref<128x256xbf16, #tpu.memory_space<vmem>>, %arg4: memref<128x256xbf16, #tpu.memory_space<vmem>>, %arg5: memref<256x128xbf16, #tpu.memory_space<vmem>>, %arg6: memref<16x128xf32, #tpu.memory_space<vmem>>, %arg7: memref<16x128xf32, #tpu.memory_space<vmem>>) attributes {dimension_semantics = [#tpu.dimension_semantics<parallel>, #tpu.dimension_semantics<arbitrary>], iteration_bounds = array<i64: 1, 1>, scalar_prefetch = 0 : i64, scratch_operands = 1 : i64, tpu.core_type = #tpu.core_type<tc>, window_params = [{transform_indices = @transform_0, window_bounds = array<i64: 16, 128>}, {transform_indices = @transform_1, window_bounds = array<i64: 128, 256>}, {transform_indices = @transform_2, window_bounds = array<i64: 128, 256>}, {transform_indices = @transform_3, window_bounds = array<i64: 256, 128>}, {transform_indices = @transform_4, window_bounds = array<i64: 16, 128>}]} {
    %c0 = arith.constant 0 : index
    %c0_0 = arith.constant 0 : index
    %0 = vector.load %arg2[%c0, %c0_0] : memref<16x128xbf16, #tpu.memory_space<vmem>>, vector<16x128xbf16>
    %c0_1 = arith.constant 0 : index
    %c0_2 = arith.constant 0 : index
    %1 = vector.load %arg3[%c0_1, %c0_2] : memref<128x256xbf16, #tpu.memory_space<vmem>>, vector<128x256xbf16>
    %cst = arith.constant dense<0.000000e+00> : vector<16x256xf32>
    %2 = tpu.matmul %0, %1, %cst {dimension_numbers = #tpu.dot_dimension_numbers<[1], [0], [0], [1], [0, 0, 1, 1], [], []>} : vector<16x128xbf16>, vector<128x256xbf16>, vector<16x256xf32> -> vector<16x256xf32>
    %c0_3 = arith.constant 0 : index
    %c0_4 = arith.constant 0 : index
    %3 = vector.load %arg4[%c0_3, %c0_4] : memref<128x256xbf16, #tpu.memory_space<vmem>>, vector<128x256xbf16>
    %cst_5 = arith.constant dense<0.000000e+00> : vector<16x256xf32>
    %4 = tpu.matmul %0, %3, %cst_5 {dimension_numbers = #tpu.dot_dimension_numbers<[1], [0], [0], [1], [0, 0, 1, 1], [], []>} : vector<16x128xbf16>, vector<128x256xbf16>, vector<16x256xf32> -> vector<16x256xf32>
    %5 = arith.negf %2 : vector<16x256xf32>
    %6 = math.exp %5 : vector<16x256xf32>
    %cst_6 = arith.constant 1.000000e+00 : f32
    %7 = vector.broadcast %cst_6 : f32 to vector<16x256xf32>
    %8 = arith.addf %7, %6 : vector<16x256xf32>
    %9 = arith.divf %7, %8 : vector<16x256xf32>
    %10 = arith.mulf %2, %9 : vector<16x256xf32>
    %11 = arith.mulf %10, %4 : vector<16x256xf32>
    %12 = arith.truncf %11 : vector<16x256xf32> to vector<16x256xbf16>
    %c0_7 = arith.constant 0 : index
    %c0_8 = arith.constant 0 : index
    %13 = vector.load %arg5[%c0_7, %c0_8] : memref<256x128xbf16, #tpu.memory_space<vmem>>, vector<256x128xbf16>
    %cst_9 = arith.constant dense<0.000000e+00> : vector<16x128xf32>
    %14 = tpu.matmul %12, %13, %cst_9 {dimension_numbers = #tpu.dot_dimension_numbers<[1], [0], [0], [1], [0, 0, 1, 1], [], []>} : vector<16x256xbf16>, vector<256x128xbf16>, vector<16x128xf32> -> vector<16x128xf32>
    %c0_i32 = arith.constant 0 : i32
    %15 = arith.cmpi eq, %arg1, %c0_i32 : i32
    %16 = arith.extui %15 : i1 to i32
    %c0_i32_10 = arith.constant 0 : i32
    %17 = arith.cmpi ne, %16, %c0_i32_10 : i32
    scf.if %17 {
      %c0_15 = arith.constant 0 : index
      %c0_16 = arith.constant 0 : index
      %24 = vector.load %arg7[%c0_15, %c0_16] : memref<16x128xf32, #tpu.memory_space<vmem>>, vector<16x128xf32>
      tpu.vector_store %arg7[%c0_15, %c0_16], %14 {strides = array<i32>} : memref<16x128xf32, #tpu.memory_space<vmem>>, vector<16x128xf32>,
    } else {
    }
    %c0_i32_11 = arith.constant 0 : i32
    %18 = arith.cmpi sgt, %arg1, %c0_i32_11 : i32
    %19 = arith.extui %18 : i1 to i32
    %c0_i32_12 = arith.constant 0 : i32
    %20 = arith.cmpi ne, %19, %c0_i32_12 : i32
    scf.if %20 {
      %c0_15 = arith.constant 0 : index
      %c0_16 = arith.constant 0 : index
      %24 = vector.load %arg7[%c0_15, %c0_16] : memref<16x128xf32, #tpu.memory_space<vmem>>, vector<16x128xf32>
      %25 = arith.addf %24, %14 : vector<16x128xf32>
      %c0_17 = arith.constant 0 : index
      %c0_18 = arith.constant 0 : index
      %26 = vector.load %arg7[%c0_17, %c0_18] : memref<16x128xf32, #tpu.memory_space<vmem>>, vector<16x128xf32>
      tpu.vector_store %arg7[%c0_17, %c0_18], %25 {strides = array<i32>} : memref<16x128xf32, #tpu.memory_space<vmem>>, vector<16x128xf32>,
    } else {
    }
    %c0_i32_13 = arith.constant 0 : i32
    %21 = arith.cmpi eq, %arg1, %c0_i32_13 : i32
    %22 = arith.extui %21 : i1 to i32
    %c0_i32_14 = arith.constant 0 : i32
    %23 = arith.cmpi ne, %22, %c0_i32_14 : i32
    scf.if %23 {
      %c0_15 = arith.constant 0 : index
      %c0_16 = arith.constant 0 : index
      %24 = vector.load %arg7[%c0_15, %c0_16] : memref<16x128xf32, #tpu.memory_space<vmem>>, vector<16x128xf32>
      %c0_17 = arith.constant 0 : index
      %c0_18 = arith.constant 0 : index
      %25 = vector.load %arg6[%c0_17, %c0_18] : memref<16x128xf32, #tpu.memory_space<vmem>>, vector<16x128xf32>
      tpu.vector_store %arg6[%c0_17, %c0_18], %24 {strides = array<i32>} : memref<16x128xf32, #tpu.memory_space<vmem>>, vector<16x128xf32>,
    } else {
    }
    return
  }
  func.func @transform_0(%arg0: i32, %arg1: i32) -> (i32, i32) {
    %c0_i32 = arith.constant 0 : i32
    %c0_i32_0 = arith.constant 0 : i32
    return %arg0, %c0_i32 : i32, i32
  }
  func.func @transform_1(%arg0: i32, %arg1: i32) -> (i32, i32) {
    %c0_i32 = arith.constant 0 : i32
    %c0_i32_0 = arith.constant 0 : i32
    return %c0_i32, %arg1 : i32, i32
  }
  func.func @transform_2(%arg0: i32, %arg1: i32) -> (i32, i32) {
    %c0_i32 = arith.constant 0 : i32
    %c0_i32_0 = arith.constant 0 : i32
    return %c0_i32, %arg1 : i32, i32
  }
  func.func @transform_3(%arg0: i32, %arg1: i32) -> (i32, i32) {
    %c0_i32 = arith.constant 0 : i32
    %c0_i32_0 = arith.constant 0 : i32
    return %arg1, %c0_i32 : i32, i32
  }
  func.func @transform_4(%arg0: i32, %arg1: i32) -> (i32, i32) {
    %c0_i32 = arith.constant 0 : i32
    %c0_i32_0 = arith.constant 0 : i32
    return %arg0, %c0_i32 : i32, i32
  }
}

</mosaic_0001>

<bundles_post_ra>
// kernel: tpu_custom_call.1
= control target key start
LH: loop header
LB: loop body
LE: loop exit
PB: predicated region body
PF: predicated region fallthrough
CT: control target
= control target key end

     0   :  { %9 = vsyncpa [#allocation4], 0  ;;  %s1111_s0 = inlined_call_operand.hbm [shape: bf16[16,128], index: 0, kind: input, shape index: {}]   ;;  %s1112_s1 = inlined_call_operand.hbm [shape: bf16[128,256], index: 1, kind: input, shape index: {}]   ;;  %s1113_s2 = inlined_call_operand.hbm [shape: bf16[128,256], index: 2, kind: input, shape index: {}]   ;;  %s1114_s3 = inlined_call_operand.hbm [shape: bf16[256,128], index: 3, kind: input, shape index: {}]   ;;  %s1115_s4 = inlined_call_operand.hbm [shape: f32[16,128], index: 4, kind: output, shape index: {}]  }
   0x1   :  { %10 = vsyncpa [#allocation7], 0 }
   0x2   :  { %11 = vsyncpa [#allocation10], 0  ;;  %s30_s17 = sshll.u32 %s1112_s1, 4  ;;  %s31_s17 = int_to_ptr.hbm [resolvable:$true] %s30_s17 }
   0x3   :  { %12 = vsyncpa [#allocation5], 0  ;;  %s1025_s18 = smov [#allocation6]   ;;  %s17_s22 = sshll.u32 %s1111_s0, 4  ;;  %s18_s22 = int_to_ptr.hbm [resolvable:$true] %s17_s22 }
   0x4   :  { %s32_s19 = sshll.u32 %s1025_s18, 4  ;;  %s1026_s23 = smov 128   ;;  %s33_s19 = int_to_ptr.vmem [resolvable:$true] %s32_s19 }
   0x5   :  { %s1027_s24 = smov 8   ;;  %s1028_s25 = smov [#allocation3]  }
   0x6   :  { %38 = dma.hbm_to_vmem [thread:$0]  %s31_s17, 2048, %s33_s19, [#allocation7], %s1026_s23, %s1026_s23, %s1027_s24  }
   0x7   :  { %s19_s26 = sshll.u32 %s1028_s25, 4  ;;  %s1029_s1 = smov 64   ;;  %s20_s26 = int_to_ptr.vmem [resolvable:$true] %s19_s26 }
   0x8   :  { %s1030_s27 = smov 4   ;;  %s43_s30 = sshll.u32 %s1113_s2, 4  ;;  %s44_s30 = int_to_ptr.hbm [resolvable:$true] %s43_s30 }
   0x9   :  { %25 = dma.hbm_to_vmem [thread:$0]  %s18_s22, 128, %s20_s26, [#allocation4], %s1029_s1, %s1029_s1, %s1030_s27  }
   0xa   :  { %s1031_s5 = smov [#allocation8]   ;;  %s56_s8 = sshll.u32 %s1114_s3, 4  ;;  %s57_s8 = int_to_ptr.hbm [resolvable:$true] %s56_s8 }
   0xb   :  { %s45_s0 = sshll.u32 %s1031_s5, 4  ;;  %s1032_s9 = smov [#allocation9]   ;;  %s46_s0 = int_to_ptr.vmem [resolvable:$true] %s45_s0 }
   0xc   :  { %51 = dma.hbm_to_vmem [thread:$0]  %s44_s30, 2048, %s46_s0, [#allocation7], %s1026_s23, %s1026_s23, %s1027_s24  }
   0xd   :  { %s58_s10 = sshll.u32 %s1032_s9, 4  ;;  %s59_s10 = int_to_ptr.vmem [resolvable:$true] %s58_s10 }
   0xe   :  { %64 = dma.hbm_to_vmem [thread:$0]  %s57_s8, 2048, %s59_s10, [#allocation10], %s1029_s1, %s1029_s1, %s1030_s27  }
   0xf   :  { %1017 = dma.done.wait [#allocation4], 128  }
  0x10   :  { %1018 = vsyncadd [#allocation4], 4294967168 }
  0x11   :  { %1019 = dma.done.wait [#allocation7], 4096  }
  0x12   :  { %1020 = vsyncadd [#allocation7], 4294963200 }
  0x13   :  { %1021 = dma.done.wait [#allocation10], 2048  }
  0x14   :  { %1022 = vsyncadd [#allocation10], 4294965248  ;;  %v685_v0 = vld [vmem:[#allocation6 + $0x70] sm:$0xf]  ;;  %v839_v1 = vld [vmem:[#allocation6 + $0x74] sm:$0xf0] }
  0x15   :  { %v838_v2 = vld [vmem:[#allocation6 + $0x74] sm:$0xf]  ;;  %v686_v3 = vor.u32 %v839_v1, %v685_v0  ;;  %v687_v4 = vld [vmem:[#allocation6 + $0x78] sm:$0xf0]  ;;  %v677_v5 = vld [vmem:[#allocation6 + $0x60] sm:$0xf] }
  0x16   :  { %v837_v6 = vld [vmem:[#allocation6 + $0x64] sm:$0xf0]  ;;  %v690_v7 = vor.u32 %v838_v2, %v687_v4  ;;  %v836_v8 = vld [vmem:[#allocation6 + $0x64] sm:$0xf]  ;;  %v679_v9 = vld [vmem:[#allocation6 + $0x68] sm:$0xf0] }
  0x17   :  { %185 = vmatpush.bf16.msra.mxu0 %v686_v3  ;;  %v678_v10 = vor.u32 %v837_v6, %v677_v5  ;;  %v682_v11 = vor.u32 %v836_v8, %v679_v9  ;;  %v669_v12 = vld [vmem:[#allocation6 + $0x50] sm:$0xf]  ;;  %v835_v13 = vld [vmem:[#allocation6 + $0x54] sm:$0xf0]  ;;  %v834_v14 = vld [vmem:[#allocation6 + $0x54] sm:$0xf] }
  0x18   :  { %199 = vmatpush.bf16.msra.mxu1 %v690_v7  ;;  %v671_v15 = vld [vmem:[#allocation6 + $0x58] sm:$0xf0]  ;;  %v749_v16 = vld [vmem:[#allocation8 + $0x70] sm:$0xf]  ;;  %v670_v17 = vor.u32 %v835_v13, %v669_v12  ;;  %v855_v18 = vld [vmem:[#allocation8 + $0x74] sm:$0xf0] }
  0x19   :  { %v854_v19 = vld [vmem:[#allocation8 + $0x74] sm:$0xf]  ;;  %v751_v20 = vld [vmem:[#allocation8 + $0x78] sm:$0xf0]  ;;  %v674_v21 = vor.u32 %v834_v14, %v671_v15  ;;  %v661_v22 = vld [vmem:[#allocation6 + $0x40] sm:$0xf]  ;;  %v750_v25 = vor.u32 %v855_v18, %v749_v16 }
  0x1a   :  { %v833_v23 = vld [vmem:[#allocation6 + $0x44] sm:$0xf0]  ;;  %v832_v24 = vld [vmem:[#allocation6 + $0x44] sm:$0xf]  ;;  %v754_v26 = vor.u32 %v854_v19, %v751_v20  ;;  %v663_v27 = vld [vmem:[#allocation6 + $0x48] sm:$0xf0] }
  0x1b   :  { %186 = vmatpush.bf16.msra.mxu0 %v678_v10  ;;  %v741_v28 = vld [vmem:[#allocation8 + $0x60] sm:$0xf]  ;;  %v853_v29 = vld [vmem:[#allocation8 + $0x64] sm:$0xf0]  ;;  %309 = vmatpush.bf16.msra.mxu2 %v750_v25  ;;  %v852_v31 = vld [vmem:[#allocation8 + $0x64] sm:$0xf]  ;;  %v662_v33 = vor.u32 %v833_v23, %v661_v22  ;;  %v666_v37 = vor.u32 %v832_v24, %v663_v27 }
  0x1c   :  { %200 = vmatpush.bf16.msra.mxu1 %v682_v11  ;;  %323 = vmatpush.bf16.msra.mxu3 %v754_v26  ;;  %v742_v30 = vor.u32 %v853_v29, %v741_v28  ;;  %v743_v32 = vld [vmem:[#allocation8 + $0x68] sm:$0xf0]  ;;  %v653_v34 = vld [vmem:[#allocation6 + $0x30] sm:$0xf]  ;;  %v831_v35 = vld [vmem:[#allocation6 + $0x34] sm:$0xf0] }
  0x1d   :  { %v746_v36 = vor.u32 %v852_v31, %v743_v32  ;;  %v733_v38 = vld [vmem:[#allocation8 + $0x50] sm:$0xf]  ;;  %v851_v39 = vld [vmem:[#allocation8 + $0x54] sm:$0xf0]  ;;  %v850_v40 = vld [vmem:[#allocation8 + $0x54] sm:$0xf]  ;;  %v654_v47 = vor.u32 %v831_v35, %v653_v34 }
  0x1e   :  { %v830_v41 = vld [vmem:[#allocation6 + $0x34] sm:$0xf]  ;;  %v655_v42 = vld [vmem:[#allocation6 + $0x38] sm:$0xf0]  ;;  %v734_v44 = vor.u32 %v851_v39, %v733_v38  ;;  %v725_v46 = vld [vmem:[#allocation8 + $0x40] sm:$0xf] }
  0x1f   :  { %187 = vmatpush.bf16.msra.mxu0 %v670_v17  ;;  %v735_v43 = vld [vmem:[#allocation8 + $0x58] sm:$0xf0]  ;;  %310 = vmatpush.bf16.msra.mxu2 %v742_v30  ;;  %v849_v48 = vld [vmem:[#allocation8 + $0x44] sm:$0xf0]  ;;  %v848_v49 = vld [vmem:[#allocation8 + $0x44] sm:$0xf]  ;;  %v658_v51 = vor.u32 %v830_v41, %v655_v42 }
  0x20   :  { %201 = vmatpush.bf16.msra.mxu1 %v674_v21  ;;  %324 = vmatpush.bf16.msra.mxu3 %v746_v36  ;;  %v738_v45 = vor.u32 %v850_v40, %v735_v43  ;;  %v727_v50 = vld [vmem:[#allocation8 + $0x48] sm:$0xf0]  ;;  %v645_v52 = vld [vmem:[#allocation6 + $0x20] sm:$0xf]  ;;  %v829_v53 = vld [vmem:[#allocation6 + $0x24] sm:$0xf0]  ;;  %v726_v56 = vor.u32 %v849_v48, %v725_v46 }
  0x21   :  { %v828_v54 = vld [vmem:[#allocation6 + $0x24] sm:$0xf]  ;;  %v647_v55 = vld [vmem:[#allocation6 + $0x28] sm:$0xf0]  ;;  %v730_v57 = vor.u32 %v848_v49, %v727_v50  ;;  %v717_v58 = vld [vmem:[#allocation8 + $0x30] sm:$0xf]  ;;  %v646_v59 = vor.u32 %v829_v53, %v645_v52 }
  0x22   :  { %v847_v60 = vld [vmem:[#allocation8 + $0x34] sm:$0xf0]  ;;  %v846_v61 = vld [vmem:[#allocation8 + $0x34] sm:$0xf]  ;;  %v719_v62 = vld [vmem:[#allocation8 + $0x38] sm:$0xf0]  ;;  %v650_v63 = vor.u32 %v828_v54, %v647_v55 }
  0x23   :  { %188 = vmatpush.bf16.msra.mxu0 %v662_v33  ;;  %311 = vmatpush.bf16.msra.mxu2 %v734_v44  ;;  %v637_v0 = vld [vmem:[#allocation6 + $0x10] sm:$0xf]  ;;  %v827_v1 = vld [vmem:[#allocation6 + $0x14] sm:$0xf0]  ;;  %v826_v2 = vld [vmem:[#allocation6 + $0x14] sm:$0xf]  ;;  %v718_v4 = vor.u32 %v847_v60, %v717_v58  ;;  %v722_v5 = vor.u32 %v846_v61, %v719_v62 }
  0x24   :  { %202 = vmatpush.bf16.msra.mxu1 %v666_v37  ;;  %325 = vmatpush.bf16.msra.mxu3 %v738_v45  ;;  %v639_v3 = vld [vmem:[#allocation6 + $0x18] sm:$0xf0]  ;;  %v709_v6 = vld [vmem:[#allocation8 + $0x20] sm:$0xf]  ;;  %v638_v7 = vor.u32 %v827_v1, %v637_v0  ;;  %v845_v8 = vld [vmem:[#allocation8 + $0x24] sm:$0xf0] }
  0x25   :  { %v844_v9 = vld [vmem:[#allocation8 + $0x24] sm:$0xf]  ;;  %v711_v10 = vld [vmem:[#allocation8 + $0x28] sm:$0xf0]  ;;  %v642_v11 = vor.u32 %v826_v2, %v639_v3  ;;  %v629_v12 = vld [vmem:[#allocation6] sm:$0xf]  ;;  %v710_v16 = vor.u32 %v845_v8, %v709_v6 }
  0x26   :  { %v825_v13 = vld [vmem:[#allocation6 + $0x4] sm:$0xf0]  ;;  %v824_v14 = vld [vmem:[#allocation6 + $0x4] sm:$0xf]  ;;  %v631_v15 = vld [vmem:[#allocation6 + $0x8] sm:$0xf0]  ;;  %v714_v17 = vor.u32 %v844_v9, %v711_v10 }
  0x27   :  { %189 = vmatpush.bf16.msra.mxu0 %v654_v47  ;;  %312 = vmatpush.bf16.msra.mxu2 %v726_v56  ;;  %v630_v18 = vor.u32 %v825_v13, %v629_v12  ;;  %v701_v19 = vld [vmem:[#allocation8 + $0x10] sm:$0xf]  ;;  %v843_v20 = vld [vmem:[#allocation8 + $0x14] sm:$0xf0]  ;;  %v634_v21 = vor.u32 %v824_v14, %v631_v15  ;;  %v842_v22 = vld [vmem:[#allocation8 + $0x14] sm:$0xf] }
  0x28   :  { %203 = vmatpush.bf16.msra.mxu1 %v658_v51  ;;  %326 = vmatpush.bf16.msra.mxu3 %v730_v57  ;;  %v703_v23 = vld [vmem:[#allocation8 + $0x18] sm:$0xf0]  ;;  %v702_v25 = vor.u32 %v843_v20, %v701_v19  ;;  %v693_v27 = vld [vmem:[#allocation8] sm:$0xf]  ;;  %v841_v28 = vld [vmem:[#allocation8 + $0x4] sm:$0xf0] }
  0x29   :  { %v823_v24 = vld [vmem:[#allocation3] sm:$0xff]  ;;  %v706_v26 = vor.u32 %v842_v22, %v703_v23  ;;  %v840_v29 = vld [vmem:[#allocation8 + $0x4] sm:$0xf]  ;;  %v695_v30 = vld [vmem:[#allocation8 + $0x8] sm:$0xf0]  ;;  %v694_v31 = vor.u32 %v841_v28, %v693_v27  ;;  %s1033_s2 = smov [#allocation11]  }
  0x2a   :  { %v698_v32 = vor.u32 %v840_v29, %v695_v30  ;;  %v863_v33 = vld [vmem:[#allocation9 + $0x38] sm:$0xff]  ;;  %v862_v35 = vld [vmem:[#allocation9 + $0x30] sm:$0xff]  ;;  %v861_v37 = vld [vmem:[#allocation9 + $0x28] sm:$0xff]  ;;  %s606_s3 = sshll.u32 %s1033_s2, 4  ;;  %s608_s13 = sshll.u32 %s1115_s4, 4  ;;  %s607_s3 = int_to_ptr.vmem [resolvable:$true] %s606_s3  ;;  %s609_s13 = int_to_ptr.hbm [resolvable:$true] %s608_s13 }
  0x2b   :  { %190 = vmatpush.bf16.msra.mxu0 %v646_v59  ;;  %313 = vmatpush.bf16.msra.mxu2 %v718_v4  ;;  %v871_v34 = vld [vmem:[#allocation9 + $0x78] sm:$0xff]  ;;  %v870_v36 = vld [vmem:[#allocation9 + $0x70] sm:$0xff]  ;;  %v869_v38 = vld [vmem:[#allocation9 + $0x68] sm:$0xff] }
  0x2c   :  { %204 = vmatpush.bf16.msra.mxu1 %v650_v63  ;;  %327 = vmatpush.bf16.msra.mxu3 %v722_v5  ;;  %v860_v39 = vld [vmem:[#allocation9 + $0x20] sm:$0xff]  ;;  %v859_v41 = vld [vmem:[#allocation9 + $0x18] sm:$0xff]  ;;  %v858_v47 = vld [vmem:[#allocation9 + $0x10] sm:$0xff] }
  0x2d   :  { %v868_v40 = vld [vmem:[#allocation9 + $0x60] sm:$0xff]  ;;  %v867_v42 = vld [vmem:[#allocation9 + $0x58] sm:$0xff]  ;;  %v866_v48 = vld [vmem:[#allocation9 + $0x50] sm:$0xff] }
  0x2e   :  { %v857_v49 = vld [vmem:[#allocation9 + $0x8] sm:$0xff]  ;;  %v856_v58 = vld [vmem:[#allocation9] sm:$0xff] }
  0x2f   :  { %191 = vmatpush.bf16.msra.mxu0 %v638_v7  ;;  %314 = vmatpush.bf16.msra.mxu2 %v710_v16  ;;  %v865_v50 = vld [vmem:[#allocation9 + $0x48] sm:$0xff]  ;;  %v864_v59 = vld [vmem:[#allocation9 + $0x40] sm:$0xff] }
  0x30   :  { %205 = vmatpush.bf16.msra.mxu1 %v642_v11  ;;  %328 = vmatpush.bf16.msra.mxu3 %v714_v17 }
  0x33   :  { %192 = vmatpush.bf16.msra.mxu0 %v630_v18  ;;  %315 = vmatpush.bf16.msra.mxu2 %v702_v25 }
  0x34   :  { %206 = vmatpush.bf16.msra.mxu1 %v634_v21  ;;  %329 = vmatpush.bf16.msra.mxu3 %v706_v26 }
  0x36   :  { %193 = vmatmul.bf16.vlgmr.msra.gmra.mxu0 %v823_v24 }
  0x37   :  { %207 = vmatmul.bf16.vlgmr.msra.gmra.mxu1 %v823_v24  ;;  %316 = vmatpush.bf16.msra.mxu2 %v694_v31 }
  0x38   :  { %330 = vmatpush.bf16.msra.mxu3 %v698_v32  ;;  %551 = vmatpush.bf16.msrb.mxu0 %v863_v33 }
  0x39   :  { %565 = vmatpush.bf16.msrb.mxu1 %v871_v34 }
  0x3a   :  { %317 = vmatmul.bf16.vlgmr.msra.gmra.mxu2 %v823_v24 }
  0x3b   :  { %331 = vmatmul.bf16.vlgmr.msra.gmra.mxu3 %v823_v24 }
  0x3c   :  { %552 = vmatpush.bf16.msrb.mxu0 %v862_v35 }
  0x3d   :  { %566 = vmatpush.bf16.msrb.mxu1 %v870_v36 }
  0x40   :  { %553 = vmatpush.bf16.msrb.mxu0 %v861_v37 }
  0x41   :  { %567 = vmatpush.bf16.msrb.mxu1 %v869_v38 }
  0x44   :  { %554 = vmatpush.bf16.msrb.mxu0 %v860_v39 }
  0x45   :  { %568 = vmatpush.bf16.msrb.mxu1 %v868_v40 }
  0x48   :  { %555 = vmatpush.bf16.msrb.mxu0 %v859_v41 }
  0x49   :  { %569 = vmatpush.bf16.msrb.mxu1 %v867_v42 }
  0x4c   :  { %556 = vmatpush.bf16.msrb.mxu0 %v858_v47 }
  0x4d   :  { %570 = vmatpush.bf16.msrb.mxu1 %v866_v48 }
  0x50   :  { %557 = vmatpush.bf16.msrb.mxu0 %v857_v49 }
  0x51   :  { %571 = vmatpush.bf16.msrb.mxu1 %v865_v50 }
  0x54   :  { %558 = vmatpush.bf16.msrb.mxu0 %v856_v58 }
  0x55   :  { %572 = vmatpush.bf16.msrb.mxu1 %v864_v59 }
  0xb3   :  { %v1077_v43 = vpop.f32.mrf.mxu0 }
  0xb4   :  { %v755_v44 = vmul.f32 -1.442695, %v1077_v43  ;;  %v1080_v45 = vpop.f32.mrf.mxu1 }
  0xb5   :  { %v756_v46 = vmul.f32 -1.442695, %v1080_v45 }
  0xb6   :  { %881 = vpow2.f32 %v755_v44 }
  0xb7   :  { %883 = vpow2.f32 %v756_v46 }
  0xbb   :  { %v1083_v51 = vpop.f32.mrf.mxu0 }
  0xbc   :  { %v882_v52 = vpop.eup %881  ;;  %v757_v53 = vmul.f32 -1.442695, %v1083_v51  ;;  %v1086_v54 = vpop.f32.mrf.mxu1 }
  0xbd   :  { %v884_v55 = vpop.eup %883  ;;  %v349_v56 = vadd.f32 1.0, %v882_v52  ;;  %v758_v57 = vmul.f32 -1.442695, %v1086_v54  ;;  %v318_v17 = vpop.f32.mrf.mxu2 }
  0xbe   :  { %v350_v60 = vadd.f32 1.0, %v884_v55  ;;  %885 = vpow2.f32 %v757_v53  ;;  %v332_v28 = vpop.f32.mrf.mxu3 }
  0xbf   :  { %887 = vrcp.f32 %v349_v56  ;;  %v364_v11 = vand.u32 2147483648, %v349_v56  ;;  %vm358_vm1 = vweird.f32 %v349_v56  ;;  %v362_v12 = vand.u32 2147483647, %v349_v56 }
  0xc0   :  { %889 = vrcp.f32 %v350_v60  ;;  %v377_v16 = vand.u32 2147483647, %v350_v60  ;;  %v379_v20 = vand.u32 2147483648, %v350_v60  ;;  %vm373_vm4 = vweird.f32 %v350_v60 }
  0xc1   :  { %891 = vpow2.f32 %v758_v57  ;;  %v365_v22 = vor.u32 1.1754944e-38, %v364_v11  ;;  %vm363_vm5 = vcmp.eq.f32.partialorder %v362_v12, 8.507059e+37 }
  0xc2   :  { %vm378_vm8 = vcmp.eq.f32.partialorder %v377_v16, 8.507059e+37  ;;  %v380_v32 = vor.u32 1.1754944e-38, %v379_v20 }
  0xc4   :  { %v886_v61 = vpop.eup %885 }
  0xc5   :  { %v888_v62 = vpop.eup %887  ;;  %v351_v63 = vadd.f32 1.0, %v886_v61  ;;  %v320_v49 = vpop.f32.mrf.mxu2 }
  0xc6   :  { %v890_v0 = vpop.eup %889  ;;  %v354_v1 = vmul.f32 %v888_v62, %v349_v56  ;;  %vm359_vm0 = vweird.f32 %v888_v62  ;;  %v334_v56 = vpop.f32.mrf.mxu3 }
  0xc7   :  { %v892_v2 = vpop.eup %891  ;;  %v369_v3 = vmul.f32 %v890_v0, %v350_v60  ;;  %893 = vrcp.f32 %v351_v63  ;;  %vm1089_vm2 = vmor %vm358_vm1, %vm359_vm0  ;;  %vm374_vm3 = vweird.f32 %v890_v0  ;;  %v394_v23 = vand.u32 2147483648, %v351_v63 }
  0xc8   :  { %v355_v4 = vsub.f32 1.0, %v354_v1  ;;  %v352_v5 = vadd.f32 1.0, %v892_v2  ;;  %vm1095_vm6 = vmor %vm373_vm4, %vm374_vm3  ;;  %v392_v27 = vand.u32 2147483647, %v351_v63  ;;  %vm388_vm9 = vweird.f32 %v351_v63 }
  0xc9   :  { %v370_v6 = vsub.f32 1.0, %v369_v3  ;;  %v395_v35 = vor.u32 1.1754944e-38, %v394_v23 }
  0xca   :  { %v356_v7 = vmul.f32 %v888_v62, %v355_v4  ;;  %895 = vrcp.f32 %v352_v5  ;;  %v409_v34 = vand.u32 2147483648, %v352_v5  ;;  %v407_v37 = vand.u32 2147483647, %v352_v5 }
  0xcb   :  { %v371_v8 = vmul.f32 %v890_v0, %v370_v6  ;;  %vm393_vm12 = vcmp.eq.f32.partialorder %v392_v27, 8.507059e+37  ;;  %vm403_vm13 = vweird.f32 %v352_v5 }
  0xcc   :  { %v357_v9 = vadd.f32 %v888_v62, %v356_v7  ;;  %v410_v46 = vor.u32 1.1754944e-38, %v409_v34  ;;  %vm408_vm15 = vcmp.eq.f32.partialorder %v407_v37, 8.507059e+37 }
  0xcd   :  { %v894_v10 = vpop.eup %893  ;;  %v372_v15 = vadd.f32 %v890_v0, %v371_v8 }
  0xce   :  { %v384_v13 = vmul.f32 %v894_v10, %v351_v63  ;;  %v361_v19 = vsel %vm1089_vm2, %v888_v62, %v357_v9  ;;  %vm389_vm7 = vweird.f32 %v894_v10 }
  0xcf   :  { %v366_v29 = vsel %vm363_vm5, %v365_v22, %v361_v19  ;;  %v376_v30 = vsel %vm1095_vm6, %v890_v0, %v372_v15  ;;  %vm390_vm10 = vmor %vm388_vm9, %vm389_vm7 }
  0xd0   :  { %v896_v18 = vpop.eup %895  ;;  %v385_v21 = vsub.f32 1.0, %v384_v13  ;;  %v413_v38 = vmul.f32 %v366_v29, %v1077_v43  ;;  %v381_v39 = vsel %vm378_vm8, %v380_v32, %v376_v30 }
  0xd1   :  { %v399_v24 = vmul.f32 %v896_v18, %v352_v5  ;;  %vm404_vm11 = vweird.f32 %v896_v18  ;;  %v414_v47 = vmul.f32 %v381_v39, %v1080_v45 }
  0xd2   :  { %v386_v26 = vmul.f32 %v894_v10, %v385_v21  ;;  %vm405_vm14 = vmor %vm403_vm13, %vm404_vm11  ;;  %v417_v52 = vmul.f32 %v413_v38, %v318_v17 }
  0xd3   :  { %v400_v31 = vsub.f32 1.0, %v399_v24  ;;  %v418_v57 = vmul.f32 %v414_v47, %v332_v28 }
  0xd4   :  { %v387_v33 = vadd.f32 %v894_v10, %v386_v26 }
  0xd5   :  { %v401_v36 = vmul.f32 %v896_v18, %v400_v31 }
  0xd6   :  { %v391_v40 = vsel %vm390_vm10, %v894_v10, %v387_v33 }
  0xd7   :  { %v396_v41 = vsel %vm393_vm12, %v395_v35, %v391_v40  ;;  %v402_v42 = vadd.f32 %v896_v18, %v401_v36 }
  0xd8   :  { %v415_v44 = vmul.f32 %v396_v41, %v1083_v51 }
  0xd9   :  { %v406_v48 = vsel %vm405_vm14, %v896_v18, %v402_v42 }
  0xda   :  { %v411_v50 = vsel %vm408_vm15, %v410_v46, %v406_v48  ;;  %v419_v53 = vmul.f32 %v415_v44, %v320_v49 }
  0xdb   :  { %v416_v43 = vmul.f32 %v411_v50, %v1086_v54 }
  0xdc   :  { %v421_v55 = vpack.c.bf16 %v419_v53, %v417_v52 }
  0xdd   :  { %v420_v58 = vmul.f32 %v416_v43, %v334_v56 }
  0xde   :  { %559 = vmatmul.bf16.vlgmr.msrb.gmra.mxu0 %v421_v55 }
  0xdf   :  { %v422_v59 = vpack.c.bf16 %v420_v58, %v418_v57 }
  0xe1   :  { %573 = vmatmul.bf16.vlgmr.msrb.gmra.mxu1 %v422_v59 }
 0x15b   :  { %v560_v51 = vpop.f32.mrf.mxu0 }
 0x15e   :  { %v574_v60 = vpop.f32.mrf.mxu1 }
 0x15f   :  { %v575_v61 = vadd.f32 %v574_v60, %v560_v51 }
 0x161   :  { %600 = vst [vmem:[#allocation11] sm:$0xff] %v575_v61 }
 0x163   :  { %v562_v45 = vpop.f32.mrf.mxu0 }
 0x166   :  { %v576_v62 = vpop.f32.mrf.mxu1 }
 0x167   :  { %v577_v54 = vadd.f32 %v576_v62, %v562_v45 }
 0x169   :  { %601 = vst [vmem:[#allocation11 + $0x8] sm:$0xff] %v577_v54 }
 0x16a   :  { %614 = dma.vmem_to_hbm [thread:$0]  %s607_s3, 256, %s609_s13, [#allocation5], %s1026_s23, %s1026_s23, %s1027_s24  }
 0x16b   :  { %1023 = dma.done.wait [#allocation5], 256  }
 0x16c   :  { %1024 = vsyncadd [#allocation5], 4294967040 }
 0x16d   :  { %619 = vsyncpa [#allocation4], 1 }
 0x16e   :  { %620 = vsyncpa [#allocation7], 1 }
 0x16f   :  { %621 = vsyncpa [#allocation10], 1 }
 0x170   :  { %622 = vsyncpa [#allocation5], 1 }

</bundles_post_ra>
